<compile_context>
chip_gen: v5e
topology: v5e:2x2
jax: 0.10.0
libtpu: 0.0.40
codegen_flags: <defaults>
</compile_context>

<pallas_src>
import math
import functools

import jax
import jax.numpy as jnp
from jax.experimental import pallas as pl
from jax.experimental.pallas import tpu as pltpu


def _attention_kernel(x_ref, wqkv_ref, bqkv_ref, wo_ref, bo_ref, o_ref, *,
                      num_heads, head_size, hidden_size):
    S = x_ref.shape[1]
    H = hidden_size
    hd = head_size
    nh = num_heads

    x = x_ref[0].astype(jnp.bfloat16)                          # (S, H) bf16 MXU operand

    # ---- fused Q/K/V projection: one MXU pass with N = 3H, f32 accumulation ----
    qkv = jnp.dot(x, wqkv_ref[...],
                  preferred_element_type=jnp.float32) + bqkv_ref[0]   # (S, 3H) f32

    scale = 1.0 / math.sqrt(hd)
    # Scale applied in f32 BEFORE the bf16 cast (keeps QK^T error small).
    q = (qkv[:, :H] * scale).astype(jnp.bfloat16)               # (S, H) bf16
    k = qkv[:, H:2 * H].astype(jnp.bfloat16)
    v = qkv[:, 2 * H:].astype(jnp.bfloat16)

    # ---- head split: ONE relayout per tensor (no per-head lane slices) ----
    def to_heads(t):                                            # (S, H) -> (nh, S, hd)
        return jnp.transpose(t.reshape(S, nh, hd), (1, 0, 2))

    qh = to_heads(q)
    kh = to_heads(k)
    vh = to_heads(v)

    # ---- scores + softmax (statistics in f32), batched over heads ----
    s = jnp.einsum("nqd,nkd->nqk", qh, kh,
                   preferred_element_type=jnp.float32)          # (nh, S, S) f32
    m = jnp.max(s, axis=-1, keepdims=True)
    p = jnp.exp(s - m)                                          # reuse p; s not kept live
    p = p * pl.reciprocal(jnp.sum(p, axis=-1, keepdims=True), approx=True)
    # attn_dropout: identity (eval mode)

    ctx = jnp.einsum("nqk,nkd->nqd", p.astype(jnp.bfloat16), vh,
                     preferred_element_type=jnp.float32)        # (nh, S, hd) f32

    # ---- output projection: single well-shaped GEMM (K = H) ----
    ctx2 = jnp.transpose(ctx.astype(jnp.bfloat16), (1, 0, 2)).reshape(S, H)  # (S, H) bf16
    out = jnp.dot(ctx2, wo_ref[...],
                  preferred_element_type=jnp.float32) + bo_ref[0]            # (S, H) f32
    # proj_dropout: identity (eval mode)
    o_ref[0] = out.astype(o_ref.dtype)


def fuse_params(params):
    """One-time weight prep: fuse QKV and cast weights to bf16 (biases stay f32)."""
    wqkv = jnp.concatenate([params["wq"], params["wk"], params["wv"]],
                           axis=1).astype(jnp.bfloat16)         # (H, 3H) bf16
    bqkv = jnp.concatenate([params["bq"], params["bk"], params["bv"]], axis=1)  # (1, 3H) f32
    wo = params["wo"].astype(jnp.bfloat16)                      # (H, H) bf16
    bo = params["bo"]                                           # (1, H) f32
    return wqkv, bqkv, wo, bo
    # TODO(synk): on v5e/v6e int8 projection weights (fp8 on v7x — no int MXU path)
    # would roughly double MXU throughput on the two large GEMMs if accuracy allows.


def _vmem_limit_bytes():
    """Generation-aware VMEM request: leave headroom, never ask for all of it."""
    cap = 128 * 1024 * 1024
    try:
        info = pltpu.get_tpu_info()
        cap = getattr(info, "vmem_capacity_bytes", cap) or cap
    except Exception:
        pass
    # 64 MiB is fine on v5e/v6e (128 MiB physical); on v7x (64 MiB physical)
    # keep ~25% headroom for compiler scratch/spill.
    return min(64 * 1024 * 1024, int(cap * 3 // 4))


def attention_forward(hidden_states, fused_params, num_heads):
    """hidden_states: [B, S, H] float32. Returns (attention_output, None)."""
    B, S, H = hidden_states.shape
    hd = H // num_heads
    wqkv, bqkv, wo, bo = fused_params

    kernel = functools.partial(_attention_kernel, num_heads=num_heads,
                               head_size=hd, hidden_size=H)

    # Weight/bias index_maps are grid-invariant -> Pallas DMAs them once and
    # re-uses the resident VMEM copy across the whole batch grid; single-buffer
    # them (Buffered(1)) so the unused second pipeline buffer is not allocated.
    wqkv_spec = pl.BlockSpec((H, 3 * H), lambda b: (0, 0), pipeline_mode=pl.Buffered(1))
    bqkv_spec = pl.BlockSpec((1, 3 * H), lambda b: (0, 0), pipeline_mode=pl.Buffered(1))
    wo_spec = pl.BlockSpec((H, H), lambda b: (0, 0), pipeline_mode=pl.Buffered(1))
    bo_spec = pl.BlockSpec((1, H), lambda b: (0, 0), pipeline_mode=pl.Buffered(1))

    out = pl.pallas_call(
        kernel,
        out_shape=jax.ShapeDtypeStruct((B, S, H), hidden_states.dtype),
        grid_spec=pltpu.PrefetchScalarGridSpec(
            num_scalar_prefetch=0,
            grid=(B,),
            in_specs=[
                pl.BlockSpec((1, S, H), lambda b: (b, 0, 0)),   # x
                wqkv_spec, bqkv_spec,                            # fused Wqkv, bqkv
                wo_spec, bo_spec,                                # Wo, bo
            ],
            out_specs=pl.BlockSpec((1, S, H), lambda b: (b, 0, 0)),
        ),
        compiler_params=pltpu.CompilerParams(
            dimension_semantics=("parallel",),
            vmem_limit_bytes=_vmem_limit_bytes(),
        ),
    )(hidden_states, wqkv, bqkv, wo, bo)

    # TODO(synk): for B=1 inference on v7x (2 TensorCores) add a second parallel
    # grid axis (flash-style query tiles) so both cores are fed; for very long
    # sequences (S >~ 1024) tile the sequence with online softmax. At TransUNet
    # scale (S=196, H=768, B>=2) the per-batch monolithic block fits VMEM.
    weights = None  # module always returns None for weights
    return out, weights


def init_params(key, hidden_size):
    """Deterministic synthetic weights. Stored as (in, out) so kernel does x @ W."""
    ks = jax.random.split(key, 8)
    s = 1.0 / math.sqrt(hidden_size)
    def w(k): return jax.random.uniform(k, (hidden_size, hidden_size),
                                        jnp.float32, -s, s)
    def b(k): return jax.random.uniform(k, (1, hidden_size), jnp.float32, -s, s)
    return {
        "wq": w(ks[0]), "bq": b(ks[1]),
        "wk": w(ks[2]), "bk": b(ks[3]),
        "wv": w(ks[4]), "bv": b(ks[5]),
        "wo": w(ks[6]), "bo": b(ks[7]),
    }


def reference_attention(x, p, num_heads):
    """Pure-JAX f32 reference mirroring the PyTorch forward (eval mode)."""
    B, S, H = x.shape
    hd = H // num_heads
    q = x @ p["wq"] + p["bq"][0]
    k = x @ p["wk"] + p["bk"][0]
    v = x @ p["wv"] + p["bv"][0]
    def split(t):  # (B,S,H) -> (B, nh, S, hd)
        return t.reshape(B, S, num_heads, hd).transpose(0, 2, 1, 3)
    q, k, v = split(q), split(k), split(v)
    scores = jnp.einsum("bhqd,bhkd->bhqk", q, k) / math.sqrt(hd)
    probs = jax.nn.softmax(scores, axis=-1)
    ctx = jnp.einsum("bhqk,bhkd->bhqd", probs, v)
    ctx = ctx.transpose(0, 2, 1, 3).reshape(B, S, H)
    return ctx @ p["wo"] + p["bo"][0]


if __name__ == "__main__":
    # Small shapes consistent with the module: hidden_size=32, num_heads=4 -> head_size=8
    B, S, H = 2, 8, 32
    NUM_HEADS = 4

    key = jax.random.PRNGKey(0)
    k_x, k_p = jax.random.split(key)
    x = jax.random.normal(k_x, (B, S, H), jnp.float32)
    params = init_params(k_p, H)
    fused = fuse_params(params)

    out, weights = attention_forward(x, fused, NUM_HEADS)
    out = jax.block_until_ready(out)

    ref = reference_attention(x, params, NUM_HEADS)
    assert out.shape == (B, S, H)
    assert weights is None
    # bf16 matmul operands (f32 accumulation / f32 softmax stats) and approx
    # reciprocal on the softmax denominator -> loosened tolerance.
    assert jnp.allclose(out, ref, atol=2e-2, rtol=2e-2), "mismatch vs reference"

    # TODO(synk): dropout layers are identity (eval-mode); training-mode dropout
    # would need pltpu.prng_seed/prng_random_bits in-kernel.
    print("KERNEL_OK")
</pallas_src>

<mosaic_0001>
module attributes {stable_mosaic.version = 11 : i64} {
  func.func @_attention_kernel(%arg0: i32, %arg1: memref<1x8x32xf32, #tpu.memory_space<vmem>>, %arg2: memref<32x96xbf16, #tpu.memory_space<vmem>>, %arg3: memref<1x96xf32, #tpu.memory_space<vmem>>, %arg4: memref<32x32xbf16, #tpu.memory_space<vmem>>, %arg5: memref<1x32xf32, #tpu.memory_space<vmem>>, %arg6: memref<1x8x32xf32, #tpu.memory_space<vmem>>) attributes {dimension_semantics = [#tpu.dimension_semantics<parallel>], iteration_bounds = array<i64: 2>, scalar_prefetch = 0 : i64, scratch_operands = 0 : i64, tpu.core_type = #tpu.core_type<tc>, window_params = [{transform_indices = @transform_0, window_bounds = array<i64: 1, 8, 32>}, {pipeline_mode = #tpu.pipeline_mode<synchronous>, transform_indices = @transform_1, window_bounds = array<i64: 32, 96>}, {pipeline_mode = #tpu.pipeline_mode<synchronous>, transform_indices = @transform_2, window_bounds = array<i64: 1, 96>}, {pipeline_mode = #tpu.pipeline_mode<synchronous>, transform_indices = @transform_3, window_bounds = array<i64: 32, 32>}, {pipeline_mode = #tpu.pipeline_mode<synchronous>, transform_indices = @transform_4, window_bounds = array<i64: 1, 32>}, {transform_indices = @transform_5, window_bounds = array<i64: 1, 8, 32>}]} {
    %c0 = arith.constant 0 : index
    %c0_0 = arith.constant 0 : index
    %c0_1 = arith.constant 0 : index
    %0 = vector.load %arg1[%c0, %c0_0, %c0_1] : memref<1x8x32xf32, #tpu.memory_space<vmem>>, vector<1x8x32xf32>
    %1 = vector.shape_cast %0 : vector<1x8x32xf32> to vector<8x32xf32>
    %2 = arith.truncf %1 : vector<8x32xf32> to vector<8x32xbf16>
    %c0_2 = arith.constant 0 : index
    %c0_3 = arith.constant 0 : index
    %3 = vector.load %arg2[%c0_2, %c0_3] : memref<32x96xbf16, #tpu.memory_space<vmem>>, vector<32x96xbf16>
    %cst = arith.constant dense<0.000000e+00> : vector<8x96xf32>
    %4 = tpu.matmul %2, %3, %cst {dimension_numbers = #tpu.dot_dimension_numbers<[1], [0], [0], [1], [0, 0, 1, 1], [], []>} : vector<8x32xbf16>, vector<32x96xbf16>, vector<8x96xf32> -> vector<8x96xf32>
    %c0_4 = arith.constant 0 : index
    %c0_5 = arith.constant 0 : index
    %5 = vector.load %arg3[%c0_4, %c0_5] : memref<1x96xf32, #tpu.memory_space<vmem>>, vector<1x96xf32>
    %6 = vector.shape_cast %5 : vector<1x96xf32> to vector<96xf32>
    %7 = vector.shape_cast %6 : vector<96xf32> to vector<1x96xf32>
    %8 = vector.broadcast %7 : vector<1x96xf32> to vector<8x96xf32>
    %9 = arith.addf %4, %8 : vector<8x96xf32>
    %10 = vector.extract_strided_slice %9 {offsets = [0, 0], sizes = [8, 32], strides = [1, 1]} : vector<8x96xf32> to vector<8x32xf32>
    %cst_6 = arith.constant 0.353553385 : f32
    %11 = vector.broadcast %cst_6 : f32 to vector<8x32xf32>
    %12 = arith.mulf %10, %11 : vector<8x32xf32>
    %13 = arith.truncf %12 : vector<8x32xf32> to vector<8x32xbf16>
    %14 = vector.extract_strided_slice %9 {offsets = [0, 32], sizes = [8, 32], strides = [1, 1]} : vector<8x96xf32> to vector<8x32xf32>
    %15 = arith.truncf %14 : vector<8x32xf32> to vector<8x32xbf16>
    %16 = vector.extract_strided_slice %9 {offsets = [0, 64], sizes = [8, 32], strides = [1, 1]} : vector<8x96xf32> to vector<8x32xf32>
    %17 = arith.truncf %16 : vector<8x32xf32> to vector<8x32xbf16>
    %18 = vector.shape_cast %13 : vector<8x32xbf16> to vector<8x4x8xbf16>
    %19 = tpu.transpose %18, [1, 0, 2] : vector<8x4x8xbf16> -> vector<4x8x8xbf16>
    %20 = vector.shape_cast %15 : vector<8x32xbf16> to vector<8x4x8xbf16>
    %21 = tpu.transpose %20, [1, 0, 2] : vector<8x4x8xbf16> -> vector<4x8x8xbf16>
    %22 = vector.shape_cast %17 : vector<8x32xbf16> to vector<8x4x8xbf16>
    %23 = tpu.transpose %22, [1, 0, 2] : vector<8x4x8xbf16> -> vector<4x8x8xbf16>
    "tpu.trace_start"() <{level = 10 : i32, message = "nqd,nkd->nqk"}> : () -> ()
    %cst_7 = arith.constant dense<0.000000e+00> : vector<4x8x8xf32>
    %24 = tpu.matmul %19, %21, %cst_7 {dimension_numbers = #tpu.dot_dimension_numbers<[2], [2], [1], [1], [0, 0, 0, 1, 1, 1], [0], [0]>} : vector<4x8x8xbf16>, vector<4x8x8xbf16>, vector<4x8x8xf32> -> vector<4x8x8xf32>
    "tpu.trace_stop"() : () -> ()
    %cst_8 = arith.constant dense<0xFF800000> : vector<4x8xf32>
    %25 = vector.multi_reduction <maximumf>, %24, %cst_8 [2] : vector<4x8x8xf32> to vector<4x8xf32>
    %26 = vector.shape_cast %25 : vector<4x8xf32> to vector<4x8x1xf32>
    %27 = vector.broadcast %26 : vector<4x8x1xf32> to vector<4x8x8xf32>
    %28 = arith.subf %24, %27 : vector<4x8x8xf32>
    %29 = math.exp %28 : vector<4x8x8xf32>
    %cst_9 = arith.constant dense<0.000000e+00> : vector<4x8xf32>
    %30 = vector.multi_reduction <add>, %29, %cst_9 [2] : vector<4x8x8xf32> to vector<4x8xf32>
    %31 = vector.shape_cast %30 : vector<4x8xf32> to vector<4x8x1xf32>
    %32 = tpu.reciprocal %31 {approx = true} : vector<4x8x1xf32> -> vector<4x8x1xf32>
    %33 = vector.broadcast %32 : vector<4x8x1xf32> to vector<4x8x8xf32>
    %34 = arith.mulf %29, %33 : vector<4x8x8xf32>
    %35 = arith.truncf %34 : vector<4x8x8xf32> to vector<4x8x8xbf16>
    "tpu.trace_start"() <{level = 10 : i32, message = "nqk,nkd->nqd"}> : () -> ()
    %cst_10 = arith.constant dense<0.000000e+00> : vector<4x8x8xf32>
    %36 = tpu.matmul %35, %23, %cst_10 {dimension_numbers = #tpu.dot_dimension_numbers<[2], [1], [1], [2], [0, 0, 0, 1, 1, 2], [0], [0]>} : vector<4x8x8xbf16>, vector<4x8x8xbf16>, vector<4x8x8xf32> -> vector<4x8x8xf32>
    "tpu.trace_stop"() : () -> ()
    %37 = arith.truncf %36 : vector<4x8x8xf32> to vector<4x8x8xbf16>
    %38 = tpu.transpose %37, [1, 0, 2] : vector<4x8x8xbf16> -> vector<8x4x8xbf16>
    %39 = vector.shape_cast %38 : vector<8x4x8xbf16> to vector<8x32xbf16>
    %c0_11 = arith.constant 0 : index
    %c0_12 = arith.constant 0 : index
    %40 = vector.load %arg4[%c0_11, %c0_12] : memref<32x32xbf16, #tpu.memory_space<vmem>>, vector<32x32xbf16>
    %cst_13 = arith.constant dense<0.000000e+00> : vector<8x32xf32>
    %41 = tpu.matmul %39, %40, %cst_13 {dimension_numbers = #tpu.dot_dimension_numbers<[1], [0], [0], [1], [0, 0, 1, 1], [], []>} : vector<8x32xbf16>, vector<32x32xbf16>, vector<8x32xf32> -> vector<8x32xf32>
    %c0_14 = arith.constant 0 : index
    %c0_15 = arith.constant 0 : index
    %42 = vector.load %arg5[%c0_14, %c0_15] : memref<1x32xf32, #tpu.memory_space<vmem>>, vector<1x32xf32>
    %43 = vector.shape_cast %42 : vector<1x32xf32> to vector<32xf32>
    %44 = vector.shape_cast %43 : vector<32xf32> to vector<1x32xf32>
    %45 = vector.broadcast %44 : vector<1x32xf32> to vector<8x32xf32>
    %46 = arith.addf %41, %45 : vector<8x32xf32>
    %c0_16 = arith.constant 0 : index
    %c0_17 = arith.constant 0 : index
    %c0_18 = arith.constant 0 : index
    %47 = vector.load %arg6[%c0_16, %c0_17, %c0_18] : memref<1x8x32xf32, #tpu.memory_space<vmem>>, vector<1x8x32xf32>
    %48 = vector.shape_cast %47 : vector<1x8x32xf32> to vector<8x32xf32>
    %49 = vector.shape_cast %46 : vector<8x32xf32> to vector<1x8x32xf32>
    tpu.vector_store %arg6[%c0_16, %c0_17, %c0_18], %49 {strides = array<i32>} : memref<1x8x32xf32, #tpu.memory_space<vmem>>, vector<1x8x32xf32>,
    return
  }
  func.func @transform_0(%arg0: i32) -> (i32, i32, i32) {
    %c0_i32 = arith.constant 0 : i32
    %c0_i32_0 = arith.constant 0 : i32
    %c0_i32_1 = arith.constant 0 : i32
    return %arg0, %c0_i32, %c0_i32_0 : i32, i32, i32
  }
  func.func @transform_1(%arg0: i32) -> (i32, i32) {
    %c0_i32 = arith.constant 0 : i32
    %c0_i32_0 = arith.constant 0 : i32
    %c0_i32_1 = arith.constant 0 : i32
    return %c0_i32, %c0_i32_0 : i32, i32
  }
  func.func @transform_2(%arg0: i32) -> (i32, i32) {
    %c0_i32 = arith.constant 0 : i32
    %c0_i32_0 = arith.constant 0 : i32
    %c0_i32_1 = arith.constant 0 : i32
    return %c0_i32, %c0_i32_0 : i32, i32
  }
  func.func @transform_3(%arg0: i32) -> (i32, i32) {
    %c0_i32 = arith.constant 0 : i32
    %c0_i32_0 = arith.constant 0 : i32
    %c0_i32_1 = arith.constant 0 : i32
    return %c0_i32, %c0_i32_0 : i32, i32
  }
  func.func @transform_4(%arg0: i32) -> (i32, i32) {
    %c0_i32 = arith.constant 0 : i32
    %c0_i32_0 = arith.constant 0 : i32
    %c0_i32_1 = arith.constant 0 : i32
    return %c0_i32, %c0_i32_0 : i32, i32
  }
  func.func @transform_5(%arg0: i32) -> (i32, i32, i32) {
    %c0_i32 = arith.constant 0 : i32
    %c0_i32_0 = arith.constant 0 : i32
    %c0_i32_1 = arith.constant 0 : i32
    return %arg0, %c0_i32, %c0_i32_0 : i32, i32, i32
  }
}

</mosaic_0001>

<bundles_post_ra>
// kernel: tpu_custom_call.1
= control target key start
LH: loop header
LB: loop body
LE: loop exit
PB: predicated region body
PF: predicated region fallthrough
CT: control target
= control target key end

     0   :  { %10 = vsyncpa [#allocation3], 0  ;;  %s1861_s0 = inlined_call_operand.hbm [shape: f32[2,8,32], index: 0, kind: input, shape index: {}]   ;;  %s1862_s1 = inlined_call_operand.hbm [shape: bf16[32,96], index: 1, kind: input, shape index: {}]   ;;  %s1863_s2 = inlined_call_operand.vmem [shape: f32[1,96], index: 2, kind: input, shape index: {}]   ;;  %s1864_s3 = inlined_call_operand.hbm [shape: bf16[32,32], index: 3, kind: input, shape index: {}]   ;;  %s1865_s4 = inlined_call_operand.vmem [shape: f32[1,32], index: 4, kind: input, shape index: {}]   ;;  %s1866_s5 = inlined_call_operand.hbm [shape: f32[2,8,32], index: 5, kind: output, shape index: {}]  }
   0x1   :  { %12 = vsyncpa [#allocation3 + $0x1], 0 }
   0x2   :  { %13 = vsyncpa [#allocation6], 0 }
   0x3   :  { %14 = vsyncpa [#allocation4], 0 }
   0x4   :  { %16 = vsyncpa [#allocation4 + $0x1], 0  ;;  %s1522_s18 = smov 0   ;;  %s1524_s19 = smov 0  }
   0x5   :  { %s1526_s20 = smov 0   ;;  %s1528_s21 = smov 0  }
   0x6 LB: > { %s174_s24 = sshll.u32 %s1862_s1, 4  ;;  %s1546_s25 = sadd.s32 4294967295, %s1476_s21   ;;  %s1476_s21 = sphi %s1528_s21, %s1877_s21   ;;  %s1472_s20 = sphi %s1526_s20, %s1876_s20   ;;  %s1468_s19 = sphi %s1524_s19, %s1875_s19   ;;  %s1464_s18 = sphi %s1522_s18, %s1874_s18   ;;  %s175_s24 = int_to_ptr.hbm [resolvable:$true] %s174_s24 }
   0x7   : > { %p1174_p0 = scmp.ge.s32.totalorder %s1476_s21, 1  ;;  %p43_p1 = scmp.eq.s32.totalorder %s1546_s25, 0 }
   0x8   : > { %p163_p2 = scmp.lt.s32.totalorder %s1476_s21, 3  ;;  %s1478_s27 = smov [#allocation5]  }
   0x9   : > { %s176_s28 = sshll.u32 %s1478_s27, 4  ;;  %s191_s6 = sshll.u32 %s1864_s3, 4  ;;  %s177_s28 = int_to_ptr.vmem [resolvable:$true] %s176_s28  ;;  %s192_s6 = int_to_ptr.hbm [resolvable:$true] %s191_s6 }
   0xa   : > { %p1551_p3 = pnand %p1174_p0, %p163_p2  ;;  %s1479_s7 = smov [#allocation7]  }
   0xb   : > { %s193_s8 = sshll.u32 %s1479_s7, 4  ;;  %s1480_s9 = smov 64   ;;  %s194_s8 = int_to_ptr.vmem [resolvable:$true] %s193_s8 }
   0xc   : > { %p1231_p4 = pneg %p1551_p3  ;;  %s1481_s10 = smov 4  }
   0xd   : > { %s1173_s11 = sadd.s32 4294967294, %s1476_s21   ;;  %s1565_s12 = sadd.s32 1, %s1476_s21  }
   0xe   : > { %p1232_p6 = pnand %p1231_p4, %p43_p1  ;;  %s26_s13 = ssub.s32 %s1476_s21, %s1565_s12 }
   0xf   : > { %s29_s14 = sadd.s32 1, %s1472_s20  ;;  %p27_p7 = scmp.eq.s32.totalorder %s26_s13, 0 }
  0x10   : > { %1234 = dma.hbm_to_vmem [thread:$0]  (!%p1232_p6), %s175_s24, 256, %s177_s28, [#allocation6], %s1480_s9, %s1480_s9, %s1481_s10  }
  0x11   : > { %1237 = dma.hbm_to_vmem [thread:$0]  (!%p1232_p6), %s192_s6, 256, %s194_s8, [#allocation6], %s1480_s9, %s1480_s9, %s1481_s10  }
  0x12   : > { %p36_p8 = scmp.ne.s32.totalorder %s1472_s20, %s1468_s19  ;;  %p37_p9 = scmp.eq.s32.totalorder %s1476_s21, 0 }
  0x13   : > { %p42_p10 = scmp.ne.s32.totalorder %s1468_s19, %s1464_s18  ;;  %p150_p13 = scmp.eq.s32.totalorder %s1546_s25, 1 }
  0x14   : > { %s1576_s15 = scalar_select %p27_p7, %s1472_s20, %s29_s14  }
  0x15   : > { %p1578_p11 = por %p37_p9, %p36_p8  ;;  %p1584_p12 = por %p43_p1, %p42_p10 }
  0x16   : > { %p156_p0 = scmp.eq.s32.totalorder %s1173_s11, 1  ;;  %p1248_p2 = scmp.lt.s32.totalorder %s1476_s21, 2 }
  0x17   : > { %s210_s22 = sand.u32 1, %s1472_s20   ;;  %p1591_p4 = por %p150_p13, %p36_p8 }
  0x18   : > { %p1595_p6 = por %p156_p0, %p42_p10  ;;  %s1178_s27 = sshll.u32 %s210_s22, 3 }
  0x19   : > { %s1179_s28 = sshll.u32 %s1476_s21, 3  ;;  %s214_s7 = scalar_lea.vmem [#allocation2], %s1178_s27 }
  0x1a   : > { %s218_s6 = scalar_lea.hbm %s1861_s0, %s1179_s28  ;;  %s222_s8 = sshll.u32 %s214_s7, 4  ;;  %s223_s8 = int_to_ptr.vmem [resolvable:$true] %s222_s8 }
  0x1b   : > { %s220_s9 = sshll.u32 %s218_s6, 4  ;;  %p1605_p7 = pnand %p1248_p2, %p1578_p11  ;;  %s221_s9 = int_to_ptr.hbm [resolvable:$true] %s220_s9 }
  0x1c   : > { %s211_s11 = scalar_lea.sflag [#allocation3], %s210_s22  ;;  %s1376_s13 = sshra.s32 %s221_s9, 4  ;;  %s1377_s13 = int_to_ptr.hbm [resolvable:$true] %s1376_s13 }
  0x1d   : > { %s1378_s14 = scalar_lea.hbm %s1377_s13, 8  ;;  %p1380_p9 = pneg %p1605_p7 }
  0x1e   : > { %p1379_p8 = scmp.ne.s32.totalorder %s1377_s13, %s1378_s14  ;;  %s1383_s29 = scalar_lea.hbm %s1861_s0, 16 }
  0x1f   : > { %p1384_p11 = scmp.lt.s32.totalorder %s1377_s13, %s1861_s0  ;;  %p1385_p0 = scmp.lt.s32.totalorder %s1383_s29, %s1378_s14 }
  0x20   : > { %p1381_p10 = pnand %p1380_p9, %p1379_p8 }
  0x21   : > { %p1386_p2 = por %p1385_p0, %p1384_p11 }
  0x22   : > { %p1382_p13 = pneg %p1381_p10 }
  0x24   : > { %p1387_p5 = pnand %p1386_p2, %p1382_p13 }
  0x26   : > { %1390 = shalt.err (!%p1387_p5)
}
  0x27   : > { %1241 = dma.hbm_to_vmem [thread:$0]  (!%p1605_p7), %s221_s9, 128, %s223_s8, %s211_s11  }
  0x28   : > { %231 = sbr.rel (%p1551_p3) target bundleno = 1262 (0x4ee), region = 40  ;;  %s1622_s22 = sand.u32 (!%p1551_p3), 1, %s1468_s19  }
  0x29   : > { %s1181_s6 = sshll.u32 (!%p1551_p3), %s1622_s22, 3  ;;  %s234_s7 = scalar_lea.sflag (!%p1551_p3), [#allocation3], %s1622_s22 }
  0x2a   : > { %s237_s13 = scalar_lea.vmem (!%p1551_p3), [#allocation2], %s1181_s6 }
  0x2d   : > { %1451 = dma.done.wait (%p1584_p12), %s234_s7, 128  }
  0x2e   : > { %1453 = vsyncadd (%p1584_p12), %s234_s7, 4294967168 }
  0x2f   : > { %1455 = dma.done.wait (%p43_p1), [#allocation6], 512  }
  0x30   : > { %1457 = vsyncadd (%p43_p1), [#allocation6], 4294966784  ;;  %v1216_v0 = vld [vmem:[#allocation5 + $0x8] sm:$0xff]  ;;  %v1215_v1 = vld [vmem:[#allocation5] sm:$0xff]  ;;  %vm298_vm0 = vcmask 261120   ;;  %s1482_s17 = smov 104  }
  0x31   : > { %308 = vmatpush.bf16.msra.mxu0 %v1216_v0  ;;  %v276_v2 = vld [vmem:[%s237_s13] sm:$0xff]  ;;  %s1483_s9 = smov 120   ;;  %s1484_s10 = smov 96   ;;  %v1487_v16 = vmov 1983009808   ;;  %vm348_vm1 = vcmask 1047556  }
  0x32   : > { %v277_v3 = vpack.c.bf16 %v276_v2, %v276_v2  ;;  %v1298_v4 = vld [vmem:[%s1863_s2] ss:$0 sm:$0xff]  ;;  %s1485_s11 = smov 112   ;;  %s1486_s14 = smov 64   ;;  %v339_v17 = vunpack.c.l.s4 %v1487_v16  ;;  %v1488_v25 = vmov 1934713408  }
  0x33   : > { %v353_v26 = vunpack.c.l.s4 %v1488_v25  ;;  %vm691_vm2 = vcmask 64512   ;;  %vm819_vm3 = vcmask 1043456   ;;  %s1489_s27 = smov 8   ;;  %s1490_s28 = smov 16   ;;  %vm1026_vm4 = vcmask 130048  }
  0x34   : > { %v1650_v22 = vunpack.c.0.s8 %v339_v17  ;;  %s1491_s29 = smov 24   ;;  %vm1029_vm5 = vcmask 195584   ;;  %s1212_s30 = sshll.u32 %s1546_s25, 3 }
  0x35   : > { %309 = vmatpush.bf16.msra.mxu0 %v1215_v1  ;;  %v1654_v35 = vunpack.c.0.s8 %v353_v26  ;;  %s1079_s13 = scalar_lea.hbm %s1866_s5, %s1212_s30  ;;  %s1069_s25 = scalar_lea.sflag [#allocation4], %s1622_s22 }
  0x38   : > { %1193 = vmatmul.msk.bf16.vlgmr.msra.gmra.mxu0 %vm298_vm0, %v277_v3 }
  0xb5   : > { %v311_v5 = vpop.f32.mrf.mxu0 }
  0xb6   : > { %v312_v6 = vadd.f32 %v1298_v4, %v311_v5 }
  0xb8   : > { %v317_v7 = vpack.c.bf16 %v312_v6, %v312_v6  ;;  %v315_v9 = vmul.f32 0.35355338, %v312_v6 }
  0xba   : > { %445 = vrot.lane.b32.xlu1 %v317_v7, %s1482_s17  ;;  %441 = vrot.lane.b32.xlu0 %v317_v7, %s1483_s9  ;;  %v316_v10 = vpack.c.bf16 %v315_v9, %v315_v9 }
  0xbc   : > { %v328_v34 = vshrl.u32 %v316_v10, 16 }
  0xbd   : > { %v313_v8 = vpop.f32.mrf.mxu0 }
  0xc2   : > { %447 = vrot.lane.b32.xlu1 %v317_v7, %s1484_s10  ;;  %443 = vrot.lane.b32.xlu0 %v317_v7, %s1485_s11 }
  0xca   : > { %319 = vrot.lane.b32.xlu1 %v316_v10, %s1483_s9 }
  0xd2   : > { %569 = vrot.lane.b32.xlu1 %v317_v7, %s1486_s14 }
 0x12c   : > { %v1641_v11 = vpop.permute.xlu1 %445  ;;  %v1643_v12 = vpop.permute.xlu0 %441 }
 0x12d   : > { %453 = vrot.lane.b32.xlu0 %v1641_v11, %s1484_s10  ;;  %449 = vrot.lane.b32.xlu2 %v1643_v12, %s1484_s10 }
 0x134   : > { %v1647_v13 = vpop.permute.xlu0 %443  ;;  %v448_v15 = vpop.permute.xlu1 %447 }
 0x135   : > { %451 = vrot.lane.b32.xlu2 %v1647_v13, %s1484_s10  ;;  %323 = vrot.lane.b32.xlu0 %v316_v10, %s1482_s17  ;;  %v458_v19 = vshrl.u32 %v448_v15, 16  ;;  %s274_s17 = scalar_lea.vmem [#allocation8], %s1181_s6  ;;  %s1083_s10 = sshll.u32 %s1079_s13, 4  ;;  %s1084_s10 = int_to_ptr.hbm [resolvable:$true] %s1083_s10 }
 0x136   : > { %s1081_s9 = sshll.u32 %s274_s17, 4  ;;  %s1426_s6 = scalar_lea.hbm %s1866_s5, 16  ;;  %s1082_s9 = int_to_ptr.vmem [resolvable:$true] %s1081_s9 }
 0x13c   : > { %v320_v23 = vpop.permute.xlu1 %319 }
 0x13d   : > { %321 = vrot.lane.b32.xlu2 %v316_v10, %s1485_s11  ;;  %v329_v28 = vshrl.u32 %v320_v23, 16  ;;  %v327_v36 = vpack.i.b16 %v320_v23, %v316_v10  ;;  %s1420_s11 = sshra.s32 %s1084_s10, 4  ;;  %s1421_s11 = int_to_ptr.hbm [resolvable:$true] %s1420_s11 }
 0x13e   : > { %p1427_p12 = scmp.lt.s32.totalorder %s1421_s11, %s1866_s5 }
 0x13f   : > { %v330_v40 = vpack.i.b16 %v329_v28, %v328_v34  ;;  %v341_v47 = vperm.slane %v327_v36, %v1650_v22 }
 0x141   : > { %v368_v51 = vperm.slane %v330_v40, %v1650_v22  ;;  %v350_v0 = vrot.slane %v341_v47, 4 }
 0x143   : > { %v376_v4 = vrot.slane %v368_v51, 4 }
 0x187   : > { %v450_v14 = vpop.permute.xlu2 %449 }
 0x188   : > { %v459_v18 = vshrl.u32 %v450_v14, 16  ;;  %v457_v20 = vpack.i.b16 %v450_v14, %v448_v15 }
 0x18a   : > { %v460_v24 = vpack.i.b16 %v459_v18, %v458_v19  ;;  %v471_v27 = vperm.slane %v457_v20, %v1650_v22 }
 0x18c   : > { %v497_v30 = vperm.slane %v460_v24, %v1650_v22  ;;  %v479_v37 = vrot.slane %v471_v27, 4 }
 0x18e   : > { %v505_v41 = vrot.slane %v497_v30, 4 }
 0x18f   : > { %v452_v21 = vpop.permute.xlu2 %451 }
 0x190   : > { %v464_v31 = vshrl.u32 %v452_v21, 16 }
 0x197   : > { %v322_v45 = vpop.permute.xlu2 %321 }
 0x198   : > { %v334_v56 = vshrl.u32 %v322_v45, 16 }
 0x19f   : > { %v454_v29 = vpop.permute.xlu0 %453 }
 0x1a0   : > { %v463_v32 = vpack.i.b16 %v454_v29, %v452_v21  ;;  %v465_v33 = vshrl.u32 %v454_v29, 16 }
 0x1a2   : > { %v466_v38 = vpack.i.b16 %v465_v33, %v464_v31  ;;  %v476_v39 = vperm.slane %v463_v32, %v1650_v22 }
 0x1a4   : > { %v477_v42 = vrot.slane %v476_v39, 4  ;;  %v480_v43 = vsel %vm348_vm1, %v476_v39, %v479_v37  ;;  %v502_v44 = vperm.slane %v466_v38, %v1650_v22 }
 0x1a5   : > { %v488_v46 = vperm.slane %v480_v43, %v1654_v35 }
 0x1a6   : > { %v478_v48 = vsel %vm348_vm1, %v477_v42, %v471_v27  ;;  %v503_v49 = vrot.slane %v502_v44, 4  ;;  %v506_v50 = vsel %vm348_vm1, %v502_v44, %v505_v41 }
 0x1a7   : > { %v484_v52 = vperm.slane %v478_v48, %v1654_v35  ;;  %v491_v53 = vrot.slane %v488_v46, 4  ;;  %v514_v54 = vperm.slane %v506_v50, %v1654_v35  ;;  %v324_v55 = vpop.permute.xlu0 %323 }
 0x1a8   : > { %v504_v57 = vsel %vm348_vm1, %v503_v49, %v497_v30  ;;  %v333_v58 = vpack.i.b16 %v324_v55, %v322_v45  ;;  %v335_v59 = vshrl.u32 %v324_v55, 16 }
 0x1a9   : > { %v489_v60 = vrot.slane %v484_v52, 4  ;;  %v492_v61 = vsel %vm348_vm1, 0, %v491_v53  ;;  %v510_v62 = vperm.slane %v504_v57, %v1654_v35  ;;  %v517_v63 = vrot.slane %v514_v54, 4 }
 0x1aa   : > { %v524_v1 = vrot.slane %v492_v61, 4  ;;  %v336_v2 = vpack.i.b16 %v335_v59, %v334_v56  ;;  %v346_v3 = vperm.slane %v333_v58, %v1650_v22  ;;  %v519_v17 = vsel %vm348_vm1, %v491_v53, %v484_v52 }
 0x1ab   : > { %v490_v5 = vsel %vm348_vm1, 0, %v489_v60  ;;  %v515_v6 = vrot.slane %v510_v62, 4  ;;  %v518_v7 = vsel %vm348_vm1, 0, %v517_v63  ;;  %v538_v27 = vsel %vm348_vm1, %v517_v63, %v510_v62 }
 0x1ac   : > { %v543_v8 = vrot.slane %v518_v7, 4  ;;  %v347_v9 = vrot.slane %v346_v3, 4  ;;  %v351_v10 = vsel %vm348_vm1, %v346_v3, %v350_v0  ;;  %v373_v14 = vperm.slane %v336_v2, %v1650_v22 }
 0x1ad   : > { %v359_v15 = vperm.slane %v351_v10, %v1654_v35  ;;  %v516_v16 = vsel %vm348_vm1, 0, %v515_v6  ;;  %v525_v18 = vsel %vm348_vm1, %v524_v1, %v490_v5  ;;  %v523_v29 = vperm.slane %v519_v17, %v1650_v22 }
 0x1ae   : > { %v349_v19 = vsel %vm348_vm1, %v347_v9, %v341_v47  ;;  %v374_v20 = vrot.slane %v373_v14, 4  ;;  %v377_v21 = vsel %vm348_vm1, %v373_v14, %v376_v4  ;;  %v529_v23 = vperm.slane %v525_v18, %v1650_v22 }
 0x1af   : > { %v355_v24 = vperm.slane %v349_v19, %v1654_v35  ;;  %v362_v25 = vrot.slane %v359_v15, 4  ;;  %v385_v26 = vperm.slane %v377_v21, %v1654_v35  ;;  %v544_v31 = vsel %vm348_vm1, %v543_v8, %v516_v16 }
 0x1b0   : > { %v375_v28 = vsel %vm348_vm1, %v374_v20, %v368_v51  ;;  %v530_v30 = vrot.slane %v529_v23, 4  ;;  %v542_v39 = vperm.slane %v538_v27, %v1650_v22  ;;  %v548_v40 = vperm.slane %v544_v31, %v1650_v22 }
 0x1b1   : > { %v360_v32 = vrot.slane %v355_v24, 4  ;;  %v363_v33 = vsel %vm348_vm1, 0, %v362_v25  ;;  %v381_v34 = vperm.slane %v375_v28, %v1654_v35  ;;  %v388_v36 = vrot.slane %v385_v26, 4 }
 0x1b2   : > { %v395_v37 = vrot.slane %v363_v33, 4  ;;  %v531_v38 = vsel %vm348_vm1, %v530_v30, %v523_v29  ;;  %v390_v45 = vsel %vm348_vm1, %v362_v25, %v355_v24  ;;  %v549_v47 = vrot.slane %v548_v40, 4 }
 0x1b3   : > { %v361_v41 = vsel %vm348_vm1, 0, %v360_v32  ;;  %v386_v42 = vrot.slane %v381_v34, 4  ;;  %v389_v43 = vsel %vm348_vm1, 0, %v388_v36  ;;  %v535_v44 = vperm.slane %v531_v38, %v1654_v35 }
 0x1b4   : > { %v414_v46 = vrot.slane %v389_v43, 4  ;;  %v396_v48 = vsel %vm348_vm1, %v395_v37, %v361_v41  ;;  %v550_v52 = vsel %vm348_vm1, %v549_v47, %v542_v39  ;;  %v394_v55 = vperm.slane %v390_v45, %v1650_v22  ;;  %v570_v45 = vpop.permute.xlu1 %569 }
 0x1b5   : > { %v387_v49 = vsel %vm348_vm1, 0, %v386_v42  ;;  %v536_v50 = vrot.slane %v535_v44, 4  ;;  %v400_v51 = vperm.slane %v396_v48, %v1650_v22  ;;  %v554_v54 = vperm.slane %v550_v52, %v1654_v35 }
 0x1b6   : > { %v415_v53 = vsel %vm348_vm1, %v414_v46, %v387_v49  ;;  %v409_v57 = vsel %vm348_vm1, %v388_v36, %v381_v34  ;;  %v560_v58 = vshrl.u32 %v535_v44, 16 }
 0x1b7   : > { %v401_v56 = vrot.slane %v400_v51, 4  ;;  %v537_v59 = vsel %vm348_vm1, 0, %v536_v50  ;;  %v419_v60 = vperm.slane %v415_v53, %v1650_v22  ;;  %v559_v61 = vpack.i.b16 %v554_v54, %v535_v44 }
 0x1b8   : > { %v561_v62 = vshrl.u32 %v554_v54, 16  ;;  %v555_v63 = vrot.slane %v554_v54, 4  ;;  %v413_v2 = vperm.slane %v409_v57, %v1650_v22  ;;  %v566_v8 = vshrl.u32 %v537_v59, 16 }
 0x1b9   : > { %v402_v0 = vsel %vm348_vm1, %v401_v56, %v394_v55  ;;  %v420_v3 = vrot.slane %v419_v60, 4  ;;  %v696_v4 = vsel %vm691_vm2, %v559_v61, 0 }
 0x1ba   : > { %v406_v1 = vperm.slane %v402_v0, %v1654_v35  ;;  %v562_v5 = vpack.i.b16 %v561_v62, %v560_v58  ;;  %v556_v6 = vsel %vm348_vm1, 0, %v555_v63  ;;  %705 = vmatpush.bf16.xpose.msra.mxu1 %v696_v4  ;;  %v580_v0 = vshrl.u32 %v570_v45, 16 }
 0x1bb   : > { %v565_v7 = vpack.i.b16 %v556_v6, %v537_v59  ;;  %v567_v9 = vshrl.u32 %v556_v6, 16  ;;  %v421_v10 = vsel %vm348_vm1, %v420_v3, %v413_v2 }
 0x1bc   : > { %v715_v14 = vsel %vm691_vm2, %v562_v5, 0  ;;  %v425_v15 = vperm.slane %v421_v10, %v1654_v35  ;;  %v407_v16 = vrot.slane %v406_v1, 4  ;;  %v431_v19 = vshrl.u32 %v406_v1, 16 }
 0x1bd   : > { %724 = vmatpush.bf16.xpose.msra.mxu2 %v715_v14  ;;  %v734_v17 = vsel %vm691_vm2, %v565_v7, 0  ;;  %v568_v18 = vpack.i.b16 %v567_v9, %v566_v8 }
 0x1be   : > { %743 = vmatpush.bf16.xpose.msra.mxu3 %v734_v17  ;;  %v430_v20 = vpack.i.b16 %v425_v15, %v406_v1  ;;  %v432_v21 = vshrl.u32 %v425_v15, 16  ;;  %v408_v23 = vsel %vm348_vm1, 0, %v407_v16  ;;  %v426_v24 = vrot.slane %v425_v15, 4 }
 0x1bf   : > { %v753_v25 = vsel %vm691_vm2, %v568_v18, 0  ;;  %v437_v29 = vshrl.u32 %v408_v23, 16 }
 0x1c0   : > { %762 = vmatpush.bf16.xpose.msrb.mxu0 %v753_v25  ;;  %v433_v26 = vpack.i.b16 %v432_v21, %v431_v19  ;;  %v427_v27 = vsel %vm348_vm1, 0, %v426_v24 }
 0x1c1   : > { %v436_v28 = vpack.i.b16 %v427_v27, %v408_v23  ;;  %v438_v30 = vshrl.u32 %v427_v27, 16  ;;  %1194 = vmatmul.msk.bf16.vlgmr.msra.gmra.mxu1 %vm691_vm2, %v430_v20 }
 0x1c3   : > { %v439_v31 = vpack.i.b16 %v438_v30, %v437_v29 }
 0x1c4   : > { %1195 = vmatmul.msk.bf16.vlgmr.msra.gmra.mxu2 %vm691_vm2, %v433_v26 }
 0x1c5   : > { %1196 = vmatmul.msk.bf16.vlgmr.msra.gmra.mxu3 %vm691_vm2, %v436_v28 }
 0x1c7   : > { %1197 = vmatmul.msk.bf16.vlgmr.msrb.gmra.mxu0 %vm691_vm2, %v439_v31 }
 0x23e   : > { %v707_v32 = vpop.f32.mrf.mxu1 }
 0x23f   : > { %v768_v33 = vsel %vm691_vm2, %v707_v32, -inf }
 0x240   : > { %769 = vmax.xlane.f32.xlu0 %v768_v33 }
 0x244   : > { %v764_v34 = vpop.f32.mrf.mxu0 }
 0x245   : > { %v777_v36 = vsel %vm691_vm2, %v764_v34, -inf }
 0x246   : > { %778 = vmax.xlane.f32.xlu2 %v777_v36  ;;  %v709_v37 = vpop.f32.mrf.mxu1 }
 0x247   : > { %v726_v38 = vpop.f32.mrf.mxu2 }
 0x248   : > { %v745_v39 = vpop.f32.mrf.mxu3  ;;  %v771_v40 = vsel %vm691_vm2, %v726_v38, -inf }
 0x249   : > { %772 = vmax.xlane.f32.xlu1 %v771_v40  ;;  %v774_v42 = vsel %vm691_vm2, %v745_v39, -inf }
 0x24c   : > { %v766_v41 = vpop.f32.mrf.mxu0 }
 0x24e   : > { %775 = vmax.xlane.f32.xlu2 %v774_v42 }
 0x24f   : > { %v728_v43 = vpop.f32.mrf.mxu2 }
 0x250   : > { %v747_v44 = vpop.f32.mrf.mxu3 }
 0x254   : > { %573 = vrot.lane.b32.xlu0 %v1647_v13, %s1486_s14 }
 0x262   : > { %575 = vrot.lane.b32.xlu1 %v1641_v11, %s1486_s14 }
 0x266   : > { %571 = vrot.lane.b32.xlu2 %v1643_v12, %s1486_s14  ;;  %s1422_s14 = scalar_lea.hbm %s1421_s11, 8 }
 0x267   : > { %p1423_p1 = scmp.ne.s32.totalorder %s1421_s11, %s1422_s14  ;;  %p1428_p7 = scmp.lt.s32.totalorder %s1426_s6, %s1422_s14 }
 0x269   : > { %p1424_p3 = pnand %p1423_p1, %p1591_p4  ;;  %p1429_p8 = por %p1428_p7, %p1427_p12 }
 0x26b   : > { %p1425_p5 = pneg %p1424_p3 }
 0x26d   : > { %p1430_p9 = pnand %p1429_p8, %p1425_p5 }
 0x2b3   : > { %v770_v46 = vpop.xlane.xlu0 %769 }
 0x2b4   : > { %v780_v47 = vsub.f32 %v707_v32, %v770_v46 }
 0x2b6   : > { %v784_v48 = vmul.f32 1.442695, %v780_v47 }
 0x2b8   : > { %1300 = vpow2.f32 %v784_v48 }
 0x2b9   : > { %v779_v49 = vpop.xlane.xlu2 %778 }
 0x2ba   : > { %v783_v53 = vsub.f32 %v764_v34, %v779_v49 }
 0x2bc   : > { %v773_v50 = vpop.xlane.xlu1 %772  ;;  %v790_v12 = vmul.f32 1.442695, %v783_v53 }
 0x2bd   : > { %v781_v51 = vsub.f32 %v726_v38, %v773_v50 }
 0x2be   : > { %v1732_v52 = vpop.eup %1300 }
 0x2bf   : > { %v786_v54 = vmul.f32 1.442695, %v781_v51  ;;  %v792_v13 = vsel %vm691_vm2, %v1732_v52, 0.0 }
 0x2c0   : > { %793 = vadd.xlane.f32.xlu1 %v792_v13 }
 0x2c1   : > { %1302 = vpow2.f32 %v786_v54  ;;  %v776_v11 = vpop.xlane.xlu2 %775 }
 0x2c2   : > { %v782_v55 = vsub.f32 %v745_v39, %v776_v11 }
 0x2c4   : > { %v788_v56 = vmul.f32 1.442695, %v782_v55 }
 0x2c6   : > { %1304 = vpow2.f32 %v788_v56  ;;  %v574_v4 = vpop.permute.xlu0 %573 }
 0x2c7   : > { %v1736_v57 = vpop.eup %1302  ;;  %1306 = vpow2.f32 %v790_v12  ;;  %v586_v7 = vshrl.u32 %v574_v4, 16 }
 0x2c8   : > { %v795_v58 = vsel %vm691_vm2, %v1736_v57, 0.0 }
 0x2c9   : > { %796 = vadd.xlane.f32.xlu0 %v795_v58  ;;  %v572_v59 = vpop.permute.xlu2 %571 }
 0x2ca   : > { %v581_v62 = vshrl.u32 %v572_v59, 16  ;;  %v579_v1 = vpack.i.b16 %v572_v59, %v570_v45 }
 0x2cc   : > { %v1740_v60 = vpop.eup %1304  ;;  %v582_v3 = vpack.i.b16 %v581_v62, %v580_v0  ;;  %v593_v5 = vperm.slane %v579_v1, %v1650_v22 }
 0x2cd   : > { %v1742_v61 = vpop.eup %1306  ;;  %v798_v63 = vsel %vm691_vm2, %v1740_v60, 0.0 }
 0x2ce   : > { %799 = vadd.xlane.f32.xlu2 %v798_v63  ;;  %v801_v2 = vsel %vm691_vm2, %v1742_v61, 0.0  ;;  %v619_v8 = vperm.slane %v582_v3, %v1650_v22  ;;  %v601_v14 = vrot.slane %v593_v5, 4 }
 0x2d0   : > { %v627_v17 = vrot.slane %v619_v8, 4 }
 0x2d1   : > { %802 = vadd.xlane.f32.xlu0 %v801_v2 }
 0x2d4   : > { %v576_v6 = vpop.permute.xlu1 %575 }
 0x2d5   : > { %v585_v9 = vpack.i.b16 %v576_v6, %v574_v4  ;;  %v587_v10 = vshrl.u32 %v576_v6, 16 }
 0x2d7   : > { %v588_v15 = vpack.i.b16 %v587_v10, %v586_v7  ;;  %v598_v16 = vperm.slane %v585_v9, %v1650_v22 }
 0x2d9   : > { %v599_v18 = vrot.slane %v598_v16, 4  ;;  %v602_v19 = vsel %vm348_vm1, %v598_v16, %v601_v14  ;;  %v624_v20 = vperm.slane %v588_v15, %v1650_v22 }
 0x2da   : > { %v610_v21 = vperm.slane %v602_v19, %v1654_v35 }
 0x2db   : > { %v600_v23 = vsel %vm348_vm1, %v599_v18, %v593_v5  ;;  %v625_v24 = vrot.slane %v624_v20, 4  ;;  %v628_v25 = vsel %vm348_vm1, %v624_v20, %v627_v17 }
 0x2dc   : > { %v606_v26 = vperm.slane %v600_v23, %v1654_v35  ;;  %v613_v27 = vrot.slane %v610_v21, 4  ;;  %v636_v28 = vperm.slane %v628_v25, %v1654_v35 }
 0x2dd   : > { %v626_v29 = vsel %vm348_vm1, %v625_v24, %v619_v8 }
 0x2de   : > { %v611_v30 = vrot.slane %v606_v26, 4  ;;  %v614_v31 = vsel %vm348_vm1, 0, %v613_v27  ;;  %v632_v32 = vperm.slane %v626_v29, %v1654_v35  ;;  %v639_v33 = vrot.slane %v636_v28, 4 }
 0x2df   : > { %v646_v34 = vrot.slane %v614_v31, 4  ;;  %v641_v40 = vsel %vm348_vm1, %v613_v27, %v606_v26 }
 0x2e0   : > { %v612_v36 = vsel %vm348_vm1, 0, %v611_v30  ;;  %v637_v37 = vrot.slane %v632_v32, 4  ;;  %v640_v38 = vsel %vm348_vm1, 0, %v639_v33  ;;  %v660_v44 = vsel %vm348_vm1, %v639_v33, %v632_v32 }
 0x2e1   : > { %v665_v39 = vrot.slane %v640_v38, 4  ;;  %v647_v41 = vsel %vm348_vm1, %v646_v34, %v612_v36  ;;  %v645_v46 = vperm.slane %v641_v40, %v1650_v22  ;;  %v664_v50 = vperm.slane %v660_v44, %v1650_v22 }
 0x2e2   : > { %v638_v42 = vsel %vm348_vm1, 0, %v637_v37  ;;  %v651_v43 = vperm.slane %v647_v41, %v1650_v22 }
 0x2e3   : > { %v666_v45 = vsel %vm348_vm1, %v665_v39, %v638_v42 }
 0x2e4   : > { %v652_v47 = vrot.slane %v651_v43, 4  ;;  %v670_v48 = vperm.slane %v666_v45, %v1650_v22 }
 0x2e6   : > { %v653_v49 = vsel %vm348_vm1, %v652_v47, %v645_v46  ;;  %v671_v51 = vrot.slane %v670_v48, 4 }
 0x2e7   : > { %v657_v53 = vperm.slane %v653_v49, %v1654_v35 }
 0x2e8   : > { %v672_v54 = vsel %vm348_vm1, %v671_v51, %v664_v50 }
 0x2e9   : > { %v676_v13 = vperm.slane %v672_v54, %v1654_v35  ;;  %v658_v11 = vrot.slane %v657_v53, 4  ;;  %v682_v55 = vshrl.u32 %v657_v53, 16 }
 0x2eb   : > { %v681_v12 = vpack.i.b16 %v676_v13, %v657_v53  ;;  %v683_v56 = vshrl.u32 %v676_v13, 16  ;;  %v659_v58 = vsel %vm348_vm1, 0, %v658_v11  ;;  %v677_v59 = vrot.slane %v676_v13, 4 }
 0x2ec   : > { %v688_v2 = vshrl.u32 %v659_v58, 16 }
 0x2ed   : > { %v821_v62 = vsel %vm819_vm3, %v681_v12, 0  ;;  %v684_v63 = vpack.i.b16 %v683_v56, %v682_v55  ;;  %v678_v0 = vsel %vm348_vm1, 0, %v677_v59 }
 0x2ee   : > { %830 = vmatpush.bf16.msrb.mxu1 %v821_v62  ;;  %v687_v1 = vpack.i.b16 %v678_v0, %v659_v58  ;;  %v689_v3 = vshrl.u32 %v678_v0, 16 }
 0x2ef   : > { %v840_v4 = vsel %vm819_vm3, %v684_v63, 0 }
 0x2f0   : > { %849 = vmatpush.bf16.msrb.mxu2 %v840_v4  ;;  %v859_v5 = vsel %vm819_vm3, %v687_v1, 0  ;;  %v690_v6 = vpack.i.b16 %v689_v3, %v688_v2 }
 0x2f1   : > { %868 = vmatpush.bf16.msrb.mxu3 %v859_v5 }
 0x2f2   : > { %v878_v7 = vsel %vm819_vm3, %v690_v6, 0 }
 0x2f3   : > { %887 = vmatpush.bf16.msra.mxu0 %v878_v7 }
 0x333   : > { %v794_v8 = vpop.xlane.xlu1 %793 }
 0x334   : > { %1308 = vrcp.f32 %v794_v8 }
 0x33a   : > { %v1309_v9 = vpop.eup %1308 }
 0x33b   : > { %v808_v10 = vmul.f32 %v1309_v9, %v1732_v52 }
 0x33c   : > { %v797_v14 = vpop.xlane.xlu0 %796 }
 0x33d   : > { %1310 = vrcp.f32 %v797_v14  ;;  %v812_v15 = vpack.c.bf16 %v808_v10, %v808_v10 }
 0x33f   : > { %1198 = vmatmul.msk.bf16.vlgmr.msrb.gmra.mxu1 %vm691_vm2, %v812_v15 }
 0x341   : > { %v800_v16 = vpop.xlane.xlu2 %799 }
 0x342   : > { %1312 = vrcp.f32 %v800_v16 }
 0x343   : > { %v1311_v17 = vpop.eup %1310 }
 0x344   : > { %v809_v18 = vmul.f32 %v1311_v17, %v1736_v57  ;;  %v803_v19 = vpop.xlane.xlu0 %802 }
 0x345   : > { %1314 = vrcp.f32 %v803_v19 }
 0x346   : > { %v813_v20 = vpack.c.bf16 %v809_v18, %v809_v18 }
 0x348   : > { %v1313_v21 = vpop.eup %1312  ;;  %1199 = vmatmul.msk.bf16.vlgmr.msrb.gmra.mxu2 %vm691_vm2, %v813_v20 }
 0x349   : > { %v810_v23 = vmul.f32 %v1313_v21, %v1740_v60 }
 0x34b   : > { %v1315_v24 = vpop.eup %1314  ;;  %v814_v52 = vpack.c.bf16 %v810_v23, %v810_v23 }
 0x34c   : > { %v811_v25 = vmul.f32 %v1315_v24, %v1742_v61 }
 0x34d   : > { %1200 = vmatmul.msk.bf16.vlgmr.msrb.gmra.mxu3 %vm691_vm2, %v814_v52 }
 0x34e   : > { %v815_v26 = vpack.c.bf16 %v811_v25, %v811_v25 }
 0x350   : > { %1201 = vmatmul.msk.bf16.vlgmr.msra.gmra.mxu0 %vm691_vm2, %v815_v26 }
 0x3bc   : > { %v832_v27 = vpop.f32.mrf.mxu1 }
 0x3bd   : > { %v893_v57 = vpack.c.bf16 %v832_v27, %v832_v27 }
 0x3bf   : > { %v900_v32 = vshrl.u32 %v893_v57, 16 }
 0x3c4   : > { %v834_v28 = vpop.f32.mrf.mxu1 }
 0x3cb   : > { %v851_v29 = vpop.f32.mrf.mxu2 }
 0x3cc   : > { %v894_v30 = vpack.c.bf16 %v851_v29, %v851_v29 }
 0x3cd   : > { %v889_v31 = vpop.f32.mrf.mxu0 }
 0x3ce   : > { %v899_v33 = vpack.i.b16 %v894_v30, %v893_v57  ;;  %v901_v34 = vshrl.u32 %v894_v30, 16  ;;  %v896_v36 = vpack.c.bf16 %v889_v31, %v889_v31 }
 0x3d0   : > { %v902_v60 = vpack.i.b16 %v901_v34, %v900_v32  ;;  %v870_v37 = vpop.f32.mrf.mxu3  ;;  %v913_v38 = vperm.slane %v899_v33, %v1650_v22  ;;  %v907_v40 = vshrl.u32 %v896_v36, 16 }
 0x3d1   : > { %v895_v61 = vpack.c.bf16 %v870_v37, %v870_v37 }
 0x3d2   : > { %v939_v39 = vperm.slane %v902_v60, %v1650_v22  ;;  %v921_v44 = vrot.slane %v913_v38, 4 }
 0x3d3   : > { %v905_v41 = vpack.i.b16 %v896_v36, %v895_v61  ;;  %v906_v42 = vshrl.u32 %v895_v61, 16  ;;  %v853_v43 = vpop.f32.mrf.mxu2 }
 0x3d4   : > { %v947_v48 = vrot.slane %v939_v39, 4 }
 0x3d5   : > { %v908_v45 = vpack.i.b16 %v907_v40, %v906_v42  ;;  %v918_v46 = vperm.slane %v905_v41, %v1650_v22  ;;  %v891_v47 = vpop.f32.mrf.mxu0  ;;  %v1217_v40 = vld [vmem:[#allocation7] sm:$0xff] }
 0x3d6   : > { %v1299_v47 = vld [vmem:[%s1865_s4] ss:$0 sm:$0xff] }
 0x3d7   : > { %v919_v49 = vrot.slane %v918_v46, 4  ;;  %v922_v50 = vsel %vm348_vm1, %v918_v46, %v921_v44  ;;  %v944_v51 = vperm.slane %v908_v45, %v1650_v22 }
 0x3d8   : > { %v930_v53 = vperm.slane %v922_v50, %v1654_v35  ;;  %v872_v54 = vpop.f32.mrf.mxu3 }
 0x3d9   : > { %v920_v13 = vsel %vm348_vm1, %v919_v49, %v913_v38  ;;  %v945_v11 = vrot.slane %v944_v51, 4  ;;  %v948_v55 = vsel %vm348_vm1, %v944_v51, %v947_v48 }
 0x3da   : > { %v926_v12 = vperm.slane %v920_v13, %v1654_v35  ;;  %v933_v56 = vrot.slane %v930_v53, 4  ;;  %v956_v58 = vperm.slane %v948_v55, %v1654_v35 }
 0x3db   : > { %v946_v59 = vsel %vm348_vm1, %v945_v11, %v939_v39  ;;  %v1218_v39 = vld [vmem:[#allocation7 + $0x8] sm:$0xff] }
 0x3dc   : > { %v931_v62 = vrot.slane %v926_v12, 4  ;;  %v934_v63 = vsel %vm348_vm1, 0, %v933_v56  ;;  %v952_v0 = vperm.slane %v946_v59, %v1654_v35  ;;  %v959_v1 = vrot.slane %v956_v58, 4  ;;  %1060 = vmatpush.bf16.msra.mxu1 %v1218_v39 }
 0x3dd   : > { %v966_v2 = vrot.slane %v934_v63, 4  ;;  %v961_v6 = vsel %vm348_vm1, %v933_v56, %v926_v12 }
 0x3de   : > { %v932_v3 = vsel %vm348_vm1, 0, %v931_v62  ;;  %v957_v4 = vrot.slane %v952_v0, 4  ;;  %v960_v5 = vsel %vm348_vm1, 0, %v959_v1  ;;  %v980_v14 = vsel %vm348_vm1, %v959_v1, %v952_v0 }
 0x3df   : > { %v967_v7 = vsel %vm348_vm1, %v966_v2, %v932_v3  ;;  %v985_v8 = vrot.slane %v960_v5, 4  ;;  %v965_v16 = vperm.slane %v961_v6, %v1650_v22  ;;  %v984_v20 = vperm.slane %v980_v14, %v1650_v22 }
 0x3e0   : > { %v958_v9 = vsel %vm348_vm1, 0, %v957_v4  ;;  %v971_v10 = vperm.slane %v967_v7, %v1650_v22  ;;  %1061 = vmatpush.bf16.msra.mxu1 %v1217_v40 }
 0x3e1   : > { %v986_v15 = vsel %vm348_vm1, %v985_v8, %v958_v9 }
 0x3e2   : > { %v972_v17 = vrot.slane %v971_v10, 4  ;;  %v990_v18 = vperm.slane %v986_v15, %v1650_v22 }
 0x3e4   : > { %v973_v19 = vsel %vm348_vm1, %v972_v17, %v965_v16  ;;  %v991_v21 = vrot.slane %v990_v18, 4 }
 0x3e5   : > { %v977_v23 = vperm.slane %v973_v19, %v1654_v35 }
 0x3e6   : > { %v992_v24 = vsel %vm348_vm1, %v991_v21, %v984_v20 }
 0x3e7   : > { %v996_v52 = vperm.slane %v992_v24, %v1654_v35  ;;  %v978_v25 = vrot.slane %v977_v23, 4  ;;  %v1002_v26 = vshrl.u32 %v977_v23, 16 }
 0x3e9   : > { %v1003_v27 = vshrl.u32 %v996_v52, 16  ;;  %v979_v28 = vsel %vm348_vm1, 0, %v978_v25  ;;  %v997_v57 = vrot.slane %v996_v52, 4  ;;  %v1001_v29 = vpack.i.b16 %v996_v52, %v977_v23 }
 0x3ea   : > { %v1008_v33 = vshrl.u32 %v979_v28, 16 }
 0x3eb   : > { %v1004_v30 = vpack.i.b16 %v1003_v27, %v1002_v26  ;;  %v998_v31 = vsel %vm348_vm1, 0, %v997_v57 }
 0x3ec   : > { %v1007_v32 = vpack.i.b16 %v998_v31, %v979_v28  ;;  %v1009_v22 = vshrl.u32 %v998_v31, 16 }
 0x3ed   : > { %v1011_v34 = vunpack.c.l.b16 %v1004_v30 }
 0x3ee   : > { %v1015_v36 = vunpack.c.l.b16 %v1007_v32  ;;  %v1010_v60 = vpack.i.b16 %v1009_v22, %v1008_v33 }
 0x3ef   : > { %v1012_v37 = vpack.c.b16 %v1011_v34, %v1011_v34 }
 0x3f0   : > { %v1016_v38 = vpack.c.b16 %v1015_v36, %v1015_v36  ;;  %v1019_v61 = vunpack.c.l.b16 %v1010_v60 }
 0x3f1   : > { %1013 = vrot.lane.b32.xlu2 %v1012_v37, %s1489_s27 }
 0x3f2   : > { %1017 = vrot.lane.b32.xlu1 %v1016_v38, %s1490_s28  ;;  %v1020_v35 = vpack.c.b16 %v1019_v61, %v1019_v61 }
 0x3f4   : > { %1021 = vrot.lane.b32.xlu0 %v1020_v35, %s1491_s29 }
 0x44b   : > { %v1014_v41 = vpop.permute.xlu2 %1013 }
 0x44c   : > { %v1025_v42 = vsel %vm691_vm2, %v1001_v29, %v1014_v41 }
 0x464   : > { %v1018_v43 = vpop.permute.xlu1 %1017 }
 0x465   : > { %v1028_v44 = vsel %vm1026_vm4, %v1025_v42, %v1018_v43 }
 0x466   : > { %v1022_v45 = vpop.permute.xlu0 %1021 }
 0x467   : > { %v1031_v46 = vsel %vm1029_vm5, %v1028_v44, %v1022_v45 }
 0x468   : > { %1210 = vmatmul.msk.bf16.vlgmr.msra.gmra.mxu1 %vm298_vm0, %v1031_v46 }
 0x4e5   : > { %v1063_v48 = vpop.f32.mrf.mxu1 }
 0x4e6   : > { %v1064_v49 = vadd.f32 %v1299_v47, %v1063_v48 }
 0x4e8   : > { %1067 = vst.msk [vmem:[%s274_s17] sm:$0xff] %vm298_vm0, %v1064_v49 }
 0x4e9   : > { %1433 = shalt.err (!%p1430_p9)
}
 0x4ea   : > { %1229 = dma.vmem_to_hbm [thread:$0]  (%p1591_p4), %s1082_s9, 128, %s1084_s10, %s1069_s25  }
 0x4ed   : > { %v1065_v50 = vpop.f32.mrf.mxu1 }
 0x4ee PF: > { %s1095_s22 = sand.u32 1, %s1464_s18   ;;  %p1873_p10 = scmp.ge.s32.totalorder %s1476_s21, 2 }
 0x4ef   : > { %s1096_s16 = scalar_lea.sflag [#allocation4], %s1095_s22 }
 0x4f0   : > { %p1243_p13 = pnand %p1873_p10, %p1595_p6 }
 0x4f2   : > { %p1244_p11 = pneg %p1243_p13 }
 0x4f4   : > { %1459 = dma.done.wait (%p1244_p11), %s1096_s16, 128  }
 0x4f5   : > { %1461 = vsyncadd (%p1244_p11), %s1096_s16, 4294967168  ;;  %p19_p0 = scmp.ge.s32.totalorder %s1565_s12, 4   ;;  %s1874_s18 = smov %s1468_s19 }
 0x4f6   : > { %s1875_s19 = smov %s1472_s20  ;;  %s1876_s20 = smov %s1576_s15 }
 0x4f7   : > { %s1877_s21 = smov %s1565_s12  ;;  %21 = sbr.rel (!%p19_p0) target bundleno = 6 (0x6), region = 93 }
 0x4fc   :  { %1102 = vsyncpa [#allocation3], 1 }
 0x4fd   :  { %1104 = vsyncpa [#allocation3 + $0x1], 1 }
 0x4fe   :  { %1105 = vsyncpa [#allocation6], 1 }
 0x4ff   :  { %1106 = vsyncpa [#allocation4], 1 }
 0x500   :  { %1108 = vsyncpa [#allocation4 + $0x1], 1 }

</bundles_post_ra>
